<compile_context>
chip_gen: v5e
topology: v5e:2x2
jax: 0.10.0
libtpu: 0.0.40
codegen_flags: <defaults>
</compile_context>

<pallas_src>
import numpy as np
import jax
import jax.numpy as jnp
from jax.experimental import pallas as pl
from jax.experimental.pallas import tpu as pltpu


# --------------------------------------------------------------------------
# Kernel 1: fused pairwise statistics over two equal-shaped flat arrays.
#   per-block output[k] (8,128) partials, k in:
#     0: sum|x-y|, 1: sum (x-y)^2, 2: max(x), 3: min(x), 4: max(y), 5: min(y)
#   final scalar reduce over (grid, 6, 8, 128) partials happens in jnp.
# --------------------------------------------------------------------------
def make_pair_stats_kernel(tr, grid, tail_valid):
    # tail_valid: number of valid elements in the LAST (tr, 128) tile
    # (== tr*128 when no wrapper padding was added). Static Python int.
    nsub = tr // 8
    need_mask = tail_valid < tr * 128

    def _block_stats(x, y, masked):
        if masked:
            row = jax.lax.broadcasted_iota(jnp.int32, (tr, 128), 0)
            lane = jax.lax.broadcasted_iota(jnp.int32, (tr, 128), 1)
            valid = (row * 128 + lane) < tail_valid      # tile-local: no overflow
            d = jnp.where(valid, x - y, 0.0)
            xmx = jnp.where(valid, x, -jnp.inf)
            xmn = jnp.where(valid, x, jnp.inf)
            ymx = jnp.where(valid, y, -jnp.inf)
            ymn = jnp.where(valid, y, jnp.inf)
        else:
            d = x - y
            xmx = xmn = x
            ymx = ymn = y
        ad = jnp.abs(d)
        sq = d * d

        # Fold the (tr, 128) tile into an (8, 128) partial: reduction over the
        # leading (untiled) axis only -> pure per-vreg VPU work, no XLU.
        def fold(v, op):
            return op(v.reshape(nsub, 8, 128), axis=0)

        return (fold(ad, jnp.sum), fold(sq, jnp.sum),
                fold(xmx, jnp.max), fold(xmn, jnp.min),
                fold(ymx, jnp.max), fold(ymn, jnp.min))

    def _write(o_ref, parts):
        for k in range(6):
            o_ref[0, k] = parts[k]

    def kern(x_ref, y_ref, o_ref):
        i = pl.program_id(0)
        x = x_ref[...].astype(jnp.float32)
        y = y_ref[...].astype(jnp.float32)

        if need_mask and grid > 1:
            # Mask (iota + where chain) only exists in the last-block branch.
            @pl.when(i < grid - 1)
            def _():
                _write(o_ref, _block_stats(x, y, False))

            @pl.when(i == grid - 1)
            def _():
                _write(o_ref, _block_stats(x, y, True))
        elif need_mask:
            _write(o_ref, _block_stats(x, y, True))
        else:
            _write(o_ref, _block_stats(x, y, False))

    return kern


def pair_stats(x, y, block_rows=2048):
    """Returns (stats[6], true_numel).  stats = [sum|x-y|, sum(x-y)^2,
    max(x), min(x), max(y), min(y)].  Exact sums / max / min (the tail tile is
    masked in-kernel, so any wrapper padding never corrupts the statistics)."""
    xf = x.reshape(-1)
    yf = y.reshape(-1)
    n = xf.size

    rows = -(-n // 128)
    rows8 = -(-rows // 8) * 8              # sublane (8) divisibility
    tr = min(block_rows, rows8)            # block_rows is a multiple of 8
    grid = -(-rows8 // tr)
    total_rows = grid * tr
    total = total_rows * 128
    pad = total - n
    tail_valid = n - (grid - 1) * tr * 128
    if pad:
        # Only when numel isn't tile-aligned; padded values are masked in-kernel.
        xf = jnp.pad(xf, (0, pad))
        yf = jnp.pad(yf, (0, pad))
    x2 = xf.reshape(total_rows, 128)
    y2 = yf.reshape(total_rows, 128)

    partials = pl.pallas_call(
        make_pair_stats_kernel(tr, grid, tail_valid),
        out_shape=jax.ShapeDtypeStruct((grid, 6, 8, 128), jnp.float32),
        grid=(grid,),
        in_specs=[pl.BlockSpec((tr, 128), lambda i: (i, 0)),
                  pl.BlockSpec((tr, 128), lambda i: (i, 0))],
        out_specs=pl.BlockSpec((1, 6, 8, 128), lambda i: (i, 0, 0, 0)),
        compiler_params=pltpu.CompilerParams(
            dimension_semantics=("parallel",),
            vmem_limit_bytes=32 * 1024 * 1024),
    )(x2, y2)

    # Tiny final reduce in jnp (also keeps the fp32 accumulation pairwise-ish).
    stats = jnp.stack([
        jnp.sum(partials[:, 0]),
        jnp.sum(partials[:, 1]),
        jnp.max(partials[:, 2]),
        jnp.min(partials[:, 3]),
        jnp.max(partials[:, 4]),
        jnp.min(partials[:, 5]),
    ])
    return stats, n


# --------------------------------------------------------------------------
# Kernel 2: SSIM — in-kernel reflect padding + separable 11x11 gaussian conv
# + SSIM index, planes on the 128-lane axis (lane-dense), one 128-plane group
# per grid step; per-block partial sums, "parallel" grid.
# --------------------------------------------------------------------------
def _gaussian_1d(kernel_size, sigma):
    dist = np.arange((1 - kernel_size) / 2.0, (1 + kernel_size) / 2.0, 1.0)
    g = np.exp(-((dist / sigma) ** 2) / 2.0)
    g = g / g.sum()
    return [float(v) for v in g]


def make_ssim_kernel(gx, gy, H, W, pad_h, pad_w, nc_rem, grid):
    # nc_rem: number of valid lanes in the last 128-plane group (0 if NC%128==0).
    kH, kW = len(gx), len(gy)
    Hp, Wp = H + 2 * pad_h, W + 2 * pad_w
    Hout, Wout = Hp - kH + 1, Wp - kW + 1

    def reflect_h(x, pad):
        # reflect pad along the leading (untiled) axis: cheap concat of row slices.
        n = x.shape[0]
        top = [x[pad - j:pad - j + 1] for j in range(pad)]          # rows pad..1
        bot = [x[n - 2 - j:n - 1 - j] for j in range(pad)]          # rows n-2..n-1-pad
        return jnp.concatenate(top + [x] + bot, axis=0)

    def reflect_w(x, pad):
        # reflect pad along the sublane axis: 2*pad single-column pieces.
        n = x.shape[1]
        left = [x[:, pad - j:pad - j + 1, :] for j in range(pad)]
        right = [x[:, n - 2 - j:n - 1 - j, :] for j in range(pad)]
        return jnp.concatenate(left + [x] + right, axis=1)

    def sep_conv(x):
        # H pass first (free leading-axis slices), then the more expensive
        # sublane-sliced W pass on the smaller (Hout, Wp) volume.  Reflect
        # padding is applied per pass; P_W commutes with the per-column H conv,
        # so the result equals conv2d(reflect_pad2d(x)).
        xh = reflect_h(x, pad_h)                       # (Hp, W, 128)
        acc = gx[0] * xh[0:Hout]
        for r in range(1, kH):
            acc = acc + gx[r] * xh[r:r + Hout]         # (Hout, W, 128)
        aw = reflect_w(acc, pad_w)                     # (Hout, Wp, 128)
        out = gy[0] * aw[:, 0:Wout, :]
        for j in range(1, kW):
            out = out + gy[j] * aw[:, j:j + Wout, :]   # (Hout, Wout, 128)
        return out
        # TODO(synk): optionally run the W pass as a banded-matrix einsum on the
        # MXU (and/or bf16 inputs) if VALU-bound at large plane counts (v6e/v7x).

    def kern(c_ref, p_ref, t_ref, o_ref):
        i = pl.program_id(0)
        c1 = c_ref[0]
        c2 = c_ref[1]
        # (H, W, 128): planes on lanes -> every vector op is fully lane-dense.
        p = p_ref[...].astype(jnp.float32)
        t = t_ref[...].astype(jnp.float32)

        mu_p = sep_conv(p)
        mu_t = sep_conv(t)
        m_pp = sep_conv(p * p)
        m_tt = sep_conv(t * t)
        m_pt = sep_conv(p * t)

        mu_p_sq = mu_p * mu_p
        mu_t_sq = mu_t * mu_t
        mu_pt = mu_p * mu_t
        sig_p = m_pp - mu_p_sq
        sig_t = m_tt - mu_t_sq
        sig_pt = m_pt - mu_pt
        upper = 2.0 * sig_pt + c2
        lower = sig_p + sig_t + c2
        ssim_idx = (2.0 * mu_pt + c1) * upper / ((mu_p_sq + mu_t_sq + c1) * lower)

        cropped = ssim_idx[pad_h:Hout - pad_h, pad_w:Wout - pad_w, :]

        def put(s):
            o_ref[...] = jnp.broadcast_to(s, (1, 1, 1))

        if nc_rem:
            # Only the final 128-plane group has padded lanes -> mask only there.
            @pl.when(i < grid - 1)
            def _():
                put(jnp.sum(cropped))

            @pl.when(i == grid - 1)
            def _():
                lane = jax.lax.broadcasted_iota(jnp.int32, cropped.shape, 2)
                put(jnp.sum(jnp.where(lane < nc_rem, cropped, 0.0)))
        else:
            put(jnp.sum(cropped))

    return kern


def ssim_pallas(preds, target, stats, kernel_size=(11, 11), sigma=(1.5, 1.5),
                k1=0.01, k2=0.03):
    # preds / target: (N, C, H, W); stats reused from the shared pair_stats pass.
    data_range = jnp.maximum(stats[2] - stats[3], stats[4] - stats[5])
    c1 = (k1 * data_range) ** 2
    c2 = (k2 * data_range) ** 2

    N, C, H, W = preds.shape
    NC = N * C
    # NOTE: torchmetrics bookkeeping reproduced exactly: pad_w comes from
    # kernel_size[0], pad_h from kernel_size[1]; gx (len kernel_size[0]) runs
    # along H and gy (len kernel_size[1]) along W, as in the reference.
    pad_w = (kernel_size[0] - 1) // 2
    pad_h = (kernel_size[1] - 1) // 2
    gx = _gaussian_1d(kernel_size[0], sigma[0])
    gy = _gaussian_1d(kernel_size[1], sigma[1])

    # Lane-dense layout: (H, W, planes), planes padded up to a multiple of 128.
    # Reflect padding now happens inside the kernel (no padded HBM copies).
    NCp = -(-NC // 128) * 128
    p = jnp.pad(jnp.transpose(preds.reshape(NC, H, W), (1, 2, 0)),
                ((0, 0), (0, 0), (0, NCp - NC)))
    t = jnp.pad(jnp.transpose(target.reshape(NC, H, W), (1, 2, 0)),
                ((0, 0), (0, 0), (0, NCp - NC)))

    grid = NCp // 128
    nc_rem = NC % 128           # 0 means the last group is fully valid
    kern = make_ssim_kernel(gx, gy, H, W, pad_h, pad_w, nc_rem, grid)
    cvals = jnp.stack([c1, c2]).astype(jnp.float32)

    # TODO(synk): for large H/W (v7x 64 MiB VMEM), add an H-strip grid axis with
    # a kH-1 halo instead of full (H, W, 128) plane blocks.
    out = pl.pallas_call(
        kern,
        out_shape=jax.ShapeDtypeStruct((grid, 1, 1), jnp.float32),
        grid=(grid,),
        in_specs=[pl.BlockSpec(memory_space=pltpu.SMEM),
                  pl.BlockSpec((H, W, 128), lambda i: (0, 0, i)),
                  pl.BlockSpec((H, W, 128), lambda i: (0, 0, i))],
        out_specs=pl.BlockSpec((1, 1, 1), lambda i: (i, 0, 0)),
        compiler_params=pltpu.CompilerParams(
            dimension_semantics=("parallel",),
            vmem_limit_bytes=32 * 1024 * 1024),
    )(cvals, p, t)

    kH, kW = kernel_size[0], kernel_size[1]
    Hp, Wp = H + 2 * pad_h, W + 2 * pad_w
    Hout = Hp - kH + 1
    Wout = Wp - kW + 1
    n_crop = NC * (Hout - 2 * pad_h) * (Wout - 2 * pad_w)
    return jnp.sum(out) / n_crop


# --------------------------------------------------------------------------
# Metrics derived from the shared pair_stats pass
# --------------------------------------------------------------------------
def psnr_from_stats(stats, n, base=10.0):
    sse = stats[1]
    data_range = stats[4] - stats[5]          # target.max() - target.min()
    psnr_base_e = 2.0 * jnp.log(data_range) - jnp.log(sse / n)
    return psnr_base_e * (10.0 / jnp.log(jnp.float32(base)))


def l1_from_stats(stats, n):
    return stats[0] / n


# --------------------------------------------------------------------------
# Tiny scalar losses: plain jnp (a pallas_call launch would dominate the cost).
# --------------------------------------------------------------------------
def kl_loss(mu, logvar):
    return -0.5 * jnp.mean(jnp.sum(1.0 + logvar - mu * mu - jnp.exp(logvar), axis=1))


def hinge_losses(fake, orig):
    disc = 0.5 * (jnp.mean(jax.nn.relu(1.0 - orig)) + jnp.mean(jax.nn.relu(1.0 + fake)))
    gen = -jnp.mean(fake)
    return disc, gen


def fmap_loss_l1(fmap1, fmap2):
    loss = 0.0
    for f1, f2 in zip(fmap1, fmap2):
        loss = loss + jnp.mean(jnp.abs(f1 - f2))
    return loss / len(fmap1)


# --------------------------------------------------------------------------
# Synthetic deterministic encoder / decoder / discriminators (external modules)
# --------------------------------------------------------------------------
def make_modules(key, B, T, C, H, W, LAT):
    ks = jax.random.split(key, 6)
    W_mu = jax.random.normal(ks[0], (C, LAT), jnp.float32) * 0.1
    W_lv = jax.random.normal(ks[1], (C, LAT), jnp.float32) * 0.1
    W_mo = jax.random.normal(ks[2], (C, LAT), jnp.float32) * 0.1
    W_dec = jax.random.normal(ks[3], (LAT, C), jnp.float32) * 0.1
    Wt1 = jax.random.normal(ks[4], (C * (T - 1), 64), jnp.float32) * 0.1
    Wt2 = jax.random.normal(ks[5], (64, 16), jnp.float32) * 0.1
    Ws1 = jax.random.normal(ks[0], (C, 64), jnp.float32) * 0.1
    Ws2 = jax.random.normal(ks[1], (64, 16), jnp.float32) * 0.1

    def encoder(x):  # x: (B, C, T-1, H, W)
        feat = x.mean(axis=(2, 3, 4))                       # (B, C)
        mu = feat @ W_mu                                    # (B, LAT)
        logvar = jnp.tanh(feat @ W_lv)                      # (B, LAT)
        motion = jnp.transpose(x.mean(axis=(3, 4)), (0, 2, 1)) @ W_mo  # (B, T-1, LAT)
        return motion, mu, logvar

    def decoder(frame0, motion):  # frame0 (B,C,H,W), motion (B,T-1,LAT)
        delta = jnp.tanh(motion @ W_dec)                    # (B, T-1, C)
        return frame0[:, None] + 0.1 * delta[:, :, :, None, None]

    def disc_t(x):  # x: (B, C, Tt, H, W)
        f1 = jnp.tanh(x.mean(axis=(3, 4)))                  # (B, C, Tt)
        f2 = jnp.tanh(f1.reshape(f1.shape[0], -1) @ Wt1)    # (B, 64)
        pred = f2 @ Wt2                                     # (B, 16)
        return pred, [f1, f2]

    def disc_s(x):  # x: (K, C, H, W)
        f = jnp.tanh(x.mean(axis=(2, 3)) @ Ws1)             # (K, 64)
        return f @ Ws2                                      # (K, 16)

    return encoder, decoder, disc_t, disc_s


# --------------------------------------------------------------------------
# Backward.forward (loss computation path) in JAX + Pallas
# --------------------------------------------------------------------------
def backward_forward(encoder, decoder, disc_t, disc_s, seq_o, key,
                     w_kl=1e-4, w_coup_t=1.0, w_fmap_t=1.0, w_mse=10.0,
                     w_percep=1.0):
    B, T, C, H, W = seq_o.shape
    seq_orig = seq_o[:, 1:]                                            # (B, T-1, C, H, W)
    motion, mu, covar = encoder(jnp.transpose(seq_orig, (0, 2, 1, 3, 4)))
    seq_gen = decoder(seq_o[:, 0], motion)                             # (B, T-1, C, H, W)

    orig_flat = seq_orig.reshape(-1, C, H, W)
    gen_flat = seq_gen.reshape(-1, C, H, W)

    # Single fused statistics pass over the reconstruction tensors, reused for
    # PSNR, SSIM's data_range, and the L1 reconstruction loss.
    stats, n_obs = pair_stats(orig_flat, gen_flat)     # x=preds(orig), y=target(gen)
    PSNR = psnr_from_stats(stats, n_obs)
    SSIM = ssim_pallas(orig_flat, gen_flat, stats)
    L_recon = l1_from_stats(stats, n_obs)

    # seq_gen.size(1) = T-1 < 16 at these shapes -> no temporal subsampling
    seq_fake, seq_real = seq_gen, seq_orig

    rand_k = jax.random.randint(key, (20,), 0, B * (T - 1))
    data_fake = gen_flat[rand_k]
    data_real = orig_flat[rand_k]

    # TODO(synk): optical_flow (cv2 Farneback) + disc_to branch have no Pallas equivalent.
    # TODO(synk): gradient_penalty requires autograd through the discriminator; omitted.
    # TODO(synk): LPIPS requires a pretrained VGG network; omitted (set to 0).
    # TODO(synk): optimizer steps / .backward() / wandb logging are training-loop side effects.

    # Spatial discriminator
    pred_gen_s = disc_s(data_fake)
    pred_orig_s = disc_s(data_real)
    L_d_s, loss_gen_s = hinge_losses(pred_gen_s, pred_orig_s)

    # Temporal discriminator
    pred_gen_t, fmap_gen_t = disc_t(jnp.transpose(seq_fake, (0, 2, 1, 3, 4)))
    pred_orig_t, fmap_orig_t = disc_t(jnp.transpose(seq_real, (0, 2, 1, 3, 4)))
    L_d_t, coup_t = hinge_losses(pred_gen_t, pred_orig_t)
    L_fmap_t = fmap_loss_l1(fmap_gen_t, fmap_orig_t)

    LPIPS = jnp.float32(0.0)
    L_kl = kl_loss(mu, covar)

    Loss_VAE = (loss_gen_s
                + w_coup_t * coup_t + w_fmap_t * L_fmap_t
                + w_percep * LPIPS + w_kl * L_kl + w_mse * L_recon)

    loss_dic = {
        "Loss_VAE": Loss_VAE, "Loss_L1": L_recon, "LPIPS": LPIPS, "Loss_KL": L_kl,
        "Loss_GEN_S": loss_gen_s, "Loss_GEN_T": coup_t, "Loss_Disc_T": L_d_t,
        "Loss_Fmap_T": L_fmap_t, "Loss_Disc_S": L_d_s,
        "Logits_Real_T": jnp.mean(pred_orig_t), "Logits_Fake_T": jnp.mean(pred_gen_t),
        "Logits_Real_S": jnp.mean(pred_orig_s), "Logits_Fake_S": jnp.mean(pred_gen_s),
        "PSNR": PSNR, "SSIM": SSIM,
    }
    return loss_dic, seq_gen, seq_orig, mu, covar


# --------------------------------------------------------------------------
# Pure-JAX SSIM reference for correctness checking (non-separable 2D taps)
# --------------------------------------------------------------------------
def ssim_reference(preds, target, kernel_size=(11, 11), sigma=(1.5, 1.5),
                   k1=0.01, k2=0.03):
    data_range = jnp.maximum(preds.max() - preds.min(), target.max() - target.min())
    c1 = (k1 * data_range) ** 2
    c2 = (k2 * data_range) ** 2
    N, C, H, W = preds.shape
    pad_w = (kernel_size[0] - 1) // 2
    pad_h = (kernel_size[1] - 1) // 2
    gx = jnp.asarray(_gaussian_1d(kernel_size[0], sigma[0]), jnp.float32)
    gy = jnp.asarray(_gaussian_1d(kernel_size[1], sigma[1]), jnp.float32)
    k2d = jnp.outer(gx, gy)
    kH, kW = kernel_size
    Hp, Wp = H + 2 * pad_h, W + 2 * pad_w
    Hout, Wout = Hp - kH + 1, Wp - kW + 1
    p = jnp.pad(preds.reshape(N * C, H, W), ((0, 0), (pad_h, pad_h), (pad_w, pad_w)),
                mode="reflect")
    t = jnp.pad(target.reshape(N * C, H, W), ((0, 0), (pad_h, pad_h), (pad_w, pad_w)),
                mode="reflect")

    def conv(x):
        out = jnp.zeros((x.shape[0], Hout, Wout), jnp.float32)
        for r in range(kH):
            for c in range(kW):
                out = out + k2d[r, c] * x[:, r:r + Hout, c:c + Wout]
        return out

    mu_p, mu_t = conv(p), conv(t)
    m_pp, m_tt, m_pt = conv(p * p), conv(t * t), conv(p * t)
    sig_p = m_pp - mu_p ** 2
    sig_t = m_tt - mu_t ** 2
    sig_pt = m_pt - mu_p * mu_t
    ssim_idx = ((2 * mu_p * mu_t + c1) * (2 * sig_pt + c2)
                / ((mu_p ** 2 + mu_t ** 2 + c1) * (sig_p + sig_t + c2)))
    return jnp.mean(ssim_idx[:, pad_h:Hout - pad_h, pad_w:Wout - pad_w])


if __name__ == "__main__":
    key = jax.random.PRNGKey(0)
    B, T, C, H, W, LAT = 2, 9, 3, 16, 16, 32
    k_data, k_mod, k_sel = jax.random.split(key, 3)
    seq_o = jax.random.uniform(k_data, (B, T, C, H, W), jnp.float32)

    encoder, decoder, disc_t, disc_s = make_modules(k_mod, B, T, C, H, W, LAT)
    loss_dic, seq_gen, seq_orig, mu, covar = backward_forward(
        encoder, decoder, disc_t, disc_s, seq_o, k_sel)
    jax.block_until_ready(loss_dic)

    # correctness checks against pure-JAX references
    l1_ref = jnp.mean(jnp.abs(seq_gen - seq_orig))
    kl_ref = -0.5 * jnp.mean(jnp.sum(1 + covar - mu ** 2 - jnp.exp(covar), axis=1))
    dr = jnp.max(seq_gen) - jnp.min(seq_gen)
    sse = jnp.sum((seq_orig - seq_gen) ** 2)
    psnr_ref = (2 * jnp.log(dr) - jnp.log(sse / seq_gen.size)) * (10.0 / jnp.log(10.0))
    orig_flat = seq_orig.reshape(-1, C, H, W)
    gen_flat = seq_gen.reshape(-1, C, H, W)
    ssim_ref_val = ssim_reference(orig_flat, gen_flat)

    np.testing.assert_allclose(np.asarray(loss_dic["Loss_L1"]), np.asarray(l1_ref), rtol=1e-3)
    np.testing.assert_allclose(np.asarray(loss_dic["Loss_KL"]), np.asarray(kl_ref), rtol=1e-3)
    np.testing.assert_allclose(np.asarray(loss_dic["PSNR"]), np.asarray(psnr_ref), rtol=1e-3)
    np.testing.assert_allclose(np.asarray(loss_dic["SSIM"]), np.asarray(ssim_ref_val), rtol=1e-3)

    print("KERNEL_OK")
</pallas_src>

<mosaic_0001>
module attributes {stable_mosaic.version = 11 : i64} {
  func.func @kern(%arg0: i32, %arg1: memref<96x128xf32, #tpu.memory_space<vmem>>, %arg2: memref<96x128xf32, #tpu.memory_space<vmem>>, %arg3: memref<1x6x8x128xf32, #tpu.memory_space<vmem>>) attributes {dimension_semantics = [#tpu.dimension_semantics<parallel>], iteration_bounds = array<i64: 1>, scalar_prefetch = 0 : i64, scratch_operands = 0 : i64, tpu.core_type = #tpu.core_type<tc>, window_params = [{transform_indices = @transform_0, window_bounds = array<i64: 96, 128>}, {transform_indices = @transform_1, window_bounds = array<i64: 96, 128>}, {transform_indices = @transform_2, window_bounds = array<i64: 1, 6, 8, 128>}]} {
    %c0 = arith.constant 0 : index
    %c0_0 = arith.constant 0 : index
    %0 = vector.load %arg1[%c0, %c0_0] : memref<96x128xf32, #tpu.memory_space<vmem>>, vector<96x128xf32>
    %c0_1 = arith.constant 0 : index
    %c0_2 = arith.constant 0 : index
    %1 = vector.load %arg2[%c0_1, %c0_2] : memref<96x128xf32, #tpu.memory_space<vmem>>, vector<96x128xf32>
    %2 = arith.subf %0, %1 : vector<96x128xf32>
    %3 = math.absf %2 : vector<96x128xf32>
    %4 = arith.mulf %2, %2 : vector<96x128xf32>
    %5 = vector.shape_cast %3 : vector<96x128xf32> to vector<12x8x128xf32>
    %cst = arith.constant dense<0.000000e+00> : vector<8x128xf32>
    %6 = vector.multi_reduction <add>, %5, %cst [0] : vector<12x8x128xf32> to vector<8x128xf32>
    %7 = vector.shape_cast %4 : vector<96x128xf32> to vector<12x8x128xf32>
    %cst_3 = arith.constant dense<0.000000e+00> : vector<8x128xf32>
    %8 = vector.multi_reduction <add>, %7, %cst_3 [0] : vector<12x8x128xf32> to vector<8x128xf32>
    %9 = vector.shape_cast %0 : vector<96x128xf32> to vector<12x8x128xf32>
    %cst_4 = arith.constant dense<0xFF800000> : vector<8x128xf32>
    %10 = vector.multi_reduction <maximumf>, %9, %cst_4 [0] : vector<12x8x128xf32> to vector<8x128xf32>
    %11 = vector.shape_cast %0 : vector<96x128xf32> to vector<12x8x128xf32>
    %cst_5 = arith.constant dense<0x7F800000> : vector<8x128xf32>
    %12 = vector.multi_reduction <minimumf>, %11, %cst_5 [0] : vector<12x8x128xf32> to vector<8x128xf32>
    %13 = vector.shape_cast %1 : vector<96x128xf32> to vector<12x8x128xf32>
    %cst_6 = arith.constant dense<0xFF800000> : vector<8x128xf32>
    %14 = vector.multi_reduction <maximumf>, %13, %cst_6 [0] : vector<12x8x128xf32> to vector<8x128xf32>
    %15 = vector.shape_cast %1 : vector<96x128xf32> to vector<12x8x128xf32>
    %cst_7 = arith.constant dense<0x7F800000> : vector<8x128xf32>
    %16 = vector.multi_reduction <minimumf>, %15, %cst_7 [0] : vector<12x8x128xf32> to vector<8x128xf32>
    %c0_8 = arith.constant 0 : index
    %c0_9 = arith.constant 0 : index
    %c0_10 = arith.constant 0 : index
    %c0_11 = arith.constant 0 : index
    %17 = vector.load %arg3[%c0_8, %c0_9, %c0_10, %c0_11] : memref<1x6x8x128xf32, #tpu.memory_space<vmem>>, vector<1x1x8x128xf32>
    %18 = vector.shape_cast %17 : vector<1x1x8x128xf32> to vector<8x128xf32>
    %19 = vector.shape_cast %6 : vector<8x128xf32> to vector<1x1x8x128xf32>
    tpu.vector_store %arg3[%c0_8, %c0_9, %c0_10, %c0_11], %19 {strides = array<i32>} : memref<1x6x8x128xf32, #tpu.memory_space<vmem>>, vector<1x1x8x128xf32>,
    %c0_12 = arith.constant 0 : index
    %c1 = arith.constant 1 : index
    %c0_13 = arith.constant 0 : index
    %c0_14 = arith.constant 0 : index
    %20 = vector.load %arg3[%c0_12, %c1, %c0_13, %c0_14] : memref<1x6x8x128xf32, #tpu.memory_space<vmem>>, vector<1x1x8x128xf32>
    %21 = vector.shape_cast %20 : vector<1x1x8x128xf32> to vector<8x128xf32>
    %22 = vector.shape_cast %8 : vector<8x128xf32> to vector<1x1x8x128xf32>
    tpu.vector_store %arg3[%c0_12, %c1, %c0_13, %c0_14], %22 {strides = array<i32>} : memref<1x6x8x128xf32, #tpu.memory_space<vmem>>, vector<1x1x8x128xf32>,
    %c0_15 = arith.constant 0 : index
    %c2 = arith.constant 2 : index
    %c0_16 = arith.constant 0 : index
    %c0_17 = arith.constant 0 : index
    %23 = vector.load %arg3[%c0_15, %c2, %c0_16, %c0_17] : memref<1x6x8x128xf32, #tpu.memory_space<vmem>>, vector<1x1x8x128xf32>
    %24 = vector.shape_cast %23 : vector<1x1x8x128xf32> to vector<8x128xf32>
    %25 = vector.shape_cast %10 : vector<8x128xf32> to vector<1x1x8x128xf32>
    tpu.vector_store %arg3[%c0_15, %c2, %c0_16, %c0_17], %25 {strides = array<i32>} : memref<1x6x8x128xf32, #tpu.memory_space<vmem>>, vector<1x1x8x128xf32>,
    %c0_18 = arith.constant 0 : index
    %c3 = arith.constant 3 : index
    %c0_19 = arith.constant 0 : index
    %c0_20 = arith.constant 0 : index
    %26 = vector.load %arg3[%c0_18, %c3, %c0_19, %c0_20] : memref<1x6x8x128xf32, #tpu.memory_space<vmem>>, vector<1x1x8x128xf32>
    %27 = vector.shape_cast %26 : vector<1x1x8x128xf32> to vector<8x128xf32>
    %28 = vector.shape_cast %12 : vector<8x128xf32> to vector<1x1x8x128xf32>
    tpu.vector_store %arg3[%c0_18, %c3, %c0_19, %c0_20], %28 {strides = array<i32>} : memref<1x6x8x128xf32, #tpu.memory_space<vmem>>, vector<1x1x8x128xf32>,
    %c0_21 = arith.constant 0 : index
    %c4 = arith.constant 4 : index
    %c0_22 = arith.constant 0 : index
    %c0_23 = arith.constant 0 : index
    %29 = vector.load %arg3[%c0_21, %c4, %c0_22, %c0_23] : memref<1x6x8x128xf32, #tpu.memory_space<vmem>>, vector<1x1x8x128xf32>
    %30 = vector.shape_cast %29 : vector<1x1x8x128xf32> to vector<8x128xf32>
    %31 = vector.shape_cast %14 : vector<8x128xf32> to vector<1x1x8x128xf32>
    tpu.vector_store %arg3[%c0_21, %c4, %c0_22, %c0_23], %31 {strides = array<i32>} : memref<1x6x8x128xf32, #tpu.memory_space<vmem>>, vector<1x1x8x128xf32>,
    %c0_24 = arith.constant 0 : index
    %c5 = arith.constant 5 : index
    %c0_25 = arith.constant 0 : index
    %c0_26 = arith.constant 0 : index
    %32 = vector.load %arg3[%c0_24, %c5, %c0_25, %c0_26] : memref<1x6x8x128xf32, #tpu.memory_space<vmem>>, vector<1x1x8x128xf32>
    %33 = vector.shape_cast %32 : vector<1x1x8x128xf32> to vector<8x128xf32>
    %34 = vector.shape_cast %16 : vector<8x128xf32> to vector<1x1x8x128xf32>
    tpu.vector_store %arg3[%c0_24, %c5, %c0_25, %c0_26], %34 {strides = array<i32>} : memref<1x6x8x128xf32, #tpu.memory_space<vmem>>, vector<1x1x8x128xf32>,
    return
  }
  func.func @transform_0(%arg0: i32) -> (i32, i32) {
    %c0_i32 = arith.constant 0 : i32
    %c0_i32_0 = arith.constant 0 : i32
    return %arg0, %c0_i32 : i32, i32
  }
  func.func @transform_1(%arg0: i32) -> (i32, i32) {
    %c0_i32 = arith.constant 0 : i32
    %c0_i32_0 = arith.constant 0 : i32
    return %arg0, %c0_i32 : i32, i32
  }
  func.func @transform_2(%arg0: i32) -> (i32, i32, i32, i32) {
    %c0_i32 = arith.constant 0 : i32
    %c0_i32_0 = arith.constant 0 : i32
    %c0_i32_1 = arith.constant 0 : i32
    %c0_i32_2 = arith.constant 0 : i32
    return %arg0, %c0_i32, %c0_i32_0, %c0_i32_1 : i32, i32, i32, i32
  }
}

</mosaic_0001>

<bundles_post_ra>
// kernel: tpu_custom_call.1
= control target key start
LH: loop header
LB: loop body
LE: loop exit
PB: predicated region body
PF: predicated region fallthrough
CT: control target
= control target key end

     0   :  { %7 = vsyncpa [#allocation3], 0  ;;  %s422_s0 = inlined_call_operand.hbm [shape: f32[96,128], index: 0, kind: input, shape index: {}]   ;;  %s423_s1 = inlined_call_operand.hbm [shape: f32[96,128], index: 1, kind: input, shape index: {}]   ;;  %s424_s2 = inlined_call_operand.hbm [shape: f32[1,6,8,128], index: 2, kind: output, shape index: {}]  }
   0x1   :  { %8 = vsyncpa [#allocation6], 0 }
   0x2   :  { %9 = vsyncpa [#allocation4], 0  ;;  %s14_s11 = sshll.u32 %s422_s0, 4  ;;  %s284_s12 = smov [#allocation2]   ;;  %s15_s11 = int_to_ptr.hbm [resolvable:$true] %s14_s11 }
   0x3   :  { %s16_s13 = sshll.u32 %s284_s12, 4  ;;  %s27_s16 = sshll.u32 %s423_s1, 4  ;;  %s17_s13 = int_to_ptr.vmem [resolvable:$true] %s16_s13  ;;  %s28_s16 = int_to_ptr.hbm [resolvable:$true] %s27_s16 }
   0x4   :  { %s285_s17 = smov 128   ;;  %s286_s18 = smov 8  }
   0x5   :  { %22 = dma.hbm_to_vmem [thread:$0]  %s15_s11, 1536, %s17_s13, [#allocation3], %s285_s17, %s285_s17, %s286_s18  }
   0x6   :  { %s287_s19 = smov [#allocation5]  }
   0x7   :  { %s29_s20 = sshll.u32 %s287_s19, 4  ;;  %s30_s20 = int_to_ptr.vmem [resolvable:$true] %s29_s20 }
   0x8   :  { %35 = dma.hbm_to_vmem [thread:$0]  %s28_s16, 1536, %s30_s20, [#allocation6], %s285_s17, %s285_s17, %s286_s18  }
   0x9   :  { %278 = dma.done.wait [#allocation3], 1536  }
   0xa   :  { %279 = vsyncadd [#allocation3], 4294965760 }
   0xb   :  { %280 = dma.done.wait [#allocation6], 1536  }
   0xc   :  { %281 = vsyncadd [#allocation6], 4294965760  ;;  %v44_v0 = vld [vmem:[#allocation2] sm:$0xff]  ;;  %v45_v1 = vld [vmem:[#allocation2 + $0x8] sm:$0xff]  ;;  %s288_s0 = smov [#allocation7]   ;;  %s187_s23 = sshll.u32 %s424_s2, 4  ;;  %s188_s23 = int_to_ptr.hbm [resolvable:$true] %s187_s23 }
   0xd   :  { %v48_v2 = vld [vmem:[#allocation2 + $0x20] sm:$0xff]  ;;  %v316_v3 = vld [vmem:[#allocation2 + $0x10] sm:$0xff]  ;;  %v318_v4 = vld [vmem:[#allocation2 + $0x18] sm:$0xff]  ;;  %s185_s1 = sshll.u32 %s288_s0, 4  ;;  %s186_s1 = int_to_ptr.vmem [resolvable:$true] %s185_s1 }
   0xe   :  { %v49_v5 = vld [vmem:[#allocation2 + $0x28] sm:$0xff]  ;;  %v126_v6 = vmax.f32 %v44_v0, %v48_v2  ;;  %v320_v7 = vld [vmem:[#allocation2 + $0x30] sm:$0xff]  ;;  %v322_v8 = vld [vmem:[#allocation2 + $0x38] sm:$0xff]  ;;  %v137_v11 = vmin.f32 %v44_v0, %v48_v2 }
   0xf   :  { %v52_v9 = vld [vmem:[#allocation2 + $0x40] sm:$0xff]  ;;  %v127_v10 = vmax.f32 %v45_v1, %v49_v5  ;;  %v138_v12 = vmin.f32 %v45_v1, %v49_v5  ;;  %v53_v13 = vld [vmem:[#allocation2 + $0x48] sm:$0xff]  ;;  %v328_v16 = vld [vmem:[#allocation5 + $0x10] sm:$0xff]  ;;  %v128_v17 = vmax.f32 %v316_v3, %v320_v7  ;;  %v129_v24 = vmax.f32 %v318_v4, %v322_v8 }
  0x10   :  { %v324_v14 = vld [vmem:[#allocation5] sm:$0xff]  ;;  %v326_v15 = vld [vmem:[#allocation5 + $0x8] sm:$0xff]  ;;  %v332_v18 = vld [vmem:[#allocation5 + $0x18] sm:$0xff]  ;;  %v70_v23 = vsub.f32 %v316_v3, %v328_v16  ;;  %v130_v29 = vmax.f32 %v126_v6, %v52_v9  ;;  %v139_v30 = vmin.f32 %v316_v3, %v320_v7  ;;  %v140_v31 = vmin.f32 %v318_v4, %v322_v8 }
  0x11   :  { %v334_v19 = vld [vmem:[#allocation5 + $0x20] sm:$0xff]  ;;  %v336_v20 = vld [vmem:[#allocation5 + $0x28] sm:$0xff]  ;;  %v68_v21 = vsub.f32 %v44_v0, %v324_v14  ;;  %v69_v22 = vsub.f32 %v45_v1, %v326_v15  ;;  %v344_v25 = vld [vmem:[#allocation5 + $0x30] sm:$0xff]  ;;  %v71_v28 = vsub.f32 %v318_v4, %v332_v18  ;;  %v131_v35 = vmax.f32 %v127_v10, %v53_v13 }
  0x12   :  { %v346_v26 = vld [vmem:[#allocation5 + $0x38] sm:$0xff]  ;;  %v348_v27 = vld [vmem:[#allocation5 + $0x40] sm:$0xff]  ;;  %v356_v33 = vld [vmem:[#allocation5 + $0x48] sm:$0xff]  ;;  %v141_v36 = vmin.f32 %v137_v11, %v52_v9  ;;  %v142_v37 = vmin.f32 %v138_v12, %v53_v13  ;;  %v72_v41 = vsub.f32 %v48_v2, %v334_v19  ;;  %v73_v42 = vsub.f32 %v49_v5, %v336_v20 }
  0x13   :  { %v55_v32 = vld [vmem:[#allocation2 + $0x58] sm:$0xff]  ;;  %v80_v34 = vand.u32 2147483647, %v68_v21  ;;  %v54_v38 = vld [vmem:[#allocation2 + $0x50] sm:$0xff]  ;;  %v74_v43 = vsub.f32 %v320_v7, %v344_v25  ;;  %v81_v44 = vand.u32 2147483647, %v69_v22  ;;  %v75_v45 = vsub.f32 %v322_v8, %v346_v26 }
  0x14   :  { %v358_v39 = vld [vmem:[#allocation5 + $0x50] sm:$0xff]  ;;  %v360_v40 = vld [vmem:[#allocation5 + $0x58] sm:$0xff]  ;;  %v369_v46 = vsub.f32 %v52_v9, %v348_v27  ;;  %v372_v47 = vsub.f32 %v53_v13, %v356_v33  ;;  %v82_v48 = vand.u32 2147483647, %v70_v23  ;;  %v83_v49 = vand.u32 2147483647, %v71_v28 }
  0x15   :  { %v104_v50 = vadd.f32 %v81_v44, %v80_v34  ;;  %v132_v51 = vmax.f32 %v128_v17, %v54_v38  ;;  %v133_v52 = vmax.f32 %v129_v24, %v55_v32  ;;  %v375_v53 = vsub.f32 %v54_v38, %v358_v39 }
  0x16   :  { %v378_v54 = vsub.f32 %v55_v32, %v360_v40  ;;  %v92_v55 = vmul.f32 %v68_v21, %v68_v21  ;;  %v93_v56 = vmul.f32 %v69_v22, %v69_v22  ;;  %v84_v57 = vand.u32 2147483647, %v72_v41 }
  0x17   :  { %v85_v58 = vand.u32 2147483647, %v73_v42  ;;  %v86_v59 = vand.u32 2147483647, %v74_v43  ;;  %v105_v60 = vadd.f32 %v104_v50, %v82_v48  ;;  %v87_v61 = vand.u32 2147483647, %v75_v45 }
  0x18   :  { %v88_v62 = vand.u32 2147483647, %v369_v46  ;;  %v89_v63 = vand.u32 2147483647, %v372_v47  ;;  %v94_v0 = vmul.f32 %v70_v23, %v70_v23  ;;  %v95_v2 = vmul.f32 %v71_v28, %v71_v28 }
  0x19   :  { %v106_v1 = vadd.f32 %v105_v60, %v83_v49  ;;  %v96_v3 = vmul.f32 %v72_v41, %v72_v41  ;;  %v97_v4 = vmul.f32 %v73_v42, %v73_v42  ;;  %v98_v5 = vmul.f32 %v74_v43, %v74_v43 }
  0x1a   :  { %v115_v6 = vadd.f32 %v93_v56, %v92_v55  ;;  %v134_v7 = vmax.f32 %v130_v29, %v131_v35  ;;  %v135_v8 = vmax.f32 %v132_v51, %v133_v52  ;;  %v143_v10 = vmin.f32 %v139_v30, %v54_v38 }
  0x1b   :  { %v107_v9 = vadd.f32 %v106_v1, %v84_v57  ;;  %v144_v11 = vmin.f32 %v140_v31, %v55_v32  ;;  %v145_v12 = vmin.f32 %v141_v36, %v142_v37  ;;  %v148_v21 = vmax.f32 %v324_v14, %v334_v19 }
  0x1c   :  { %v116_v13 = vadd.f32 %v115_v6, %v94_v0  ;;  %v136_v17 = vmax.f32 %v134_v7, %v135_v8  ;;  %v149_v22 = vmax.f32 %v326_v15, %v336_v20  ;;  %v150_v28 = vmax.f32 %v328_v16, %v344_v25 }
  0x1d   :  { %v108_v23 = vadd.f32 %v107_v9, %v85_v58  ;;  %v146_v24 = vmin.f32 %v143_v10, %v144_v11  ;;  %v151_v29 = vmax.f32 %v332_v18, %v346_v26  ;;  %v152_v30 = vmax.f32 %v148_v21, %v348_v27 }
  0x1e   :  { %v117_v34 = vadd.f32 %v116_v13, %v95_v2  ;;  %174 = vst [vmem:[#allocation7 + $0x10] sm:$0xff] %v136_v17  ;;  %v153_v31 = vmax.f32 %v149_v22, %v356_v33  ;;  %v159_v32 = vmin.f32 %v324_v14, %v334_v19  ;;  %v154_v37 = vmax.f32 %v150_v28, %v358_v39 }
  0x1f   :  { %v109_v35 = vadd.f32 %v108_v23, %v86_v59  ;;  %v147_v36 = vmin.f32 %v145_v12, %v146_v24  ;;  %v155_v38 = vmax.f32 %v151_v29, %v360_v40  ;;  %v160_v43 = vmin.f32 %v326_v15, %v336_v20 }
  0x20   :  { %v118_v41 = vadd.f32 %v117_v34, %v96_v3  ;;  %v156_v42 = vmax.f32 %v152_v30, %v153_v31  ;;  %v161_v44 = vmin.f32 %v328_v16, %v344_v25  ;;  %v162_v14 = vmin.f32 %v332_v18, %v346_v26 }
  0x21   :  { %v110_v48 = vadd.f32 %v109_v35, %v87_v61  ;;  %176 = vst [vmem:[#allocation7 + $0x18] sm:$0xff] %v147_v36  ;;  %v157_v49 = vmax.f32 %v154_v37, %v155_v38  ;;  %v163_v19 = vmin.f32 %v159_v32, %v348_v27  ;;  %v99_v50 = vmul.f32 %v75_v45, %v75_v45 }
  0x22   :  { %v119_v51 = vadd.f32 %v118_v41, %v97_v4  ;;  %v164_v52 = vmin.f32 %v160_v43, %v356_v33  ;;  %v165_v55 = vmin.f32 %v161_v44, %v358_v39  ;;  %v90_v56 = vand.u32 2147483647, %v375_v53 }
  0x23   :  { %v111_v15 = vadd.f32 %v110_v48, %v88_v62  ;;  %v158_v20 = vmax.f32 %v156_v42, %v157_v49  ;;  %v166_v16 = vmin.f32 %v162_v14, %v360_v40  ;;  %v100_v25 = vmul.f32 %v369_v46, %v369_v46 }
  0x24   :  { %v120_v57 = vadd.f32 %v119_v51, %v98_v5  ;;  %v167_v58 = vmin.f32 %v163_v19, %v164_v52  ;;  %v91_v18 = vand.u32 2147483647, %v378_v54  ;;  %v101_v33 = vmul.f32 %v372_v47, %v372_v47 }
  0x25   :  { %v112_v26 = vadd.f32 %v111_v15, %v89_v63  ;;  %178 = vst [vmem:[#allocation7 + $0x20] sm:$0xff] %v158_v20  ;;  %v168_v27 = vmin.f32 %v165_v55, %v166_v16  ;;  %v102_v60 = vmul.f32 %v375_v53, %v375_v53  ;;  %v103_v46 = vmul.f32 %v378_v54, %v378_v54 }
  0x26   :  { %v121_v39 = vadd.f32 %v120_v57, %v99_v50 }
  0x27   :  { %v113_v45 = vadd.f32 %v112_v26, %v90_v56  ;;  %v169_v59 = vmin.f32 %v167_v58, %v168_v27 }
  0x28   :  { %v122_v40 = vadd.f32 %v121_v39, %v100_v25 }
  0x29   :  { %v114_v61 = vadd.f32 %v113_v45, %v91_v18  ;;  %180 = vst [vmem:[#allocation7 + $0x28] sm:$0xff] %v169_v59 }
  0x2a   :  { %v123_v62 = vadd.f32 %v122_v40, %v101_v33 }
  0x2b   :  { %170 = vst [vmem:[#allocation7] sm:$0xff] %v114_v61 }
  0x2c   :  { %v124_v47 = vadd.f32 %v123_v62, %v102_v60 }
  0x2e   :  { %v125_v63 = vadd.f32 %v124_v47, %v103_v46 }
  0x30   :  { %172 = vst [vmem:[#allocation7 + $0x8] sm:$0xff] %v125_v63 }
  0x31   :  { %193 = dma.vmem_to_hbm [thread:$0]  %s186_s1, 768, %s188_s23, [#allocation4], %s285_s17, %s285_s17, %s286_s18  }
  0x32   :  { %282 = dma.done.wait [#allocation4], 768  }
  0x33   :  { %283 = vsyncadd [#allocation4], 4294966528 }
  0x34   :  { %198 = vsyncpa [#allocation3], 1 }
  0x35   :  { %199 = vsyncpa [#allocation6], 1 }
  0x36   :  { %200 = vsyncpa [#allocation4], 1 }

</bundles_post_ra>
